<compile_context>
chip_gen: v7x
topology: tpu7x:2x2x1
jax: 0.10.0
libtpu: 0.0.40
codegen_flags: <defaults>
</compile_context>

<pallas_src>
import functools

import jax
import jax.numpy as jnp
from jax.experimental import pallas as pl
from jax.experimental.pallas import tpu as pltpu


def _round_up(a, b):
    return (a + b - 1) // b * b


def _decoder_graph_kernel(x_ref, w1_ref, b1_ref, w2_ref, b2_ref,
                          gout_ref, bout_ref, o_ref, h_ref):
    """One row-tile: LN(in, affine folded into W1/b1) -> Linear -> ReLU
    -> (Dropout = identity) -> Linear -> LN(out)."""
    eps = 1e-5
    x = x_ref[...].astype(jnp.float32)                        # (TM, C_in)

    # --- LayerNorm(in_channels); gamma/beta are folded into W1/b1 upstream.
    mu = jnp.mean(x, axis=-1, keepdims=True)
    xc = x - mu
    var = jnp.mean(xc * xc, axis=-1, keepdims=True)
    xn = xc * jax.lax.rsqrt(var + eps)                         # f32

    # --- Linear1 (+ folded LN affine) + ReLU: bf16 MXU operands, f32 accum.
    h = jnp.dot(xn.astype(jnp.bfloat16), w1_ref[...],
                preferred_element_type=jnp.float32)
    h = h + b1_ref[...]
    # Stage the intermediate in a bf16 VMEM scratch: bounds the live vreg set
    # between the two dots and feeds the second MXU dot directly.
    h_ref[...] = jnp.maximum(h, 0.0).astype(h_ref.dtype)

    # --- Dropout: identity in eval mode.
    # TODO(synk): training-mode stochastic dropout not implemented.

    # --- Linear2: bf16 MXU operands, f32 accumulation.
    y = jnp.dot(h_ref[...], w2_ref[...], preferred_element_type=jnp.float32)
    y = y + b2_ref[...]                                        # (TM, C_out)

    # --- LayerNorm(out_channels), with affine.
    mu2 = jnp.mean(y, axis=-1, keepdims=True)
    yc = y - mu2
    var2 = jnp.mean(yc * yc, axis=-1, keepdims=True)
    yn = yc * jax.lax.rsqrt(var2 + eps)
    o_ref[...] = (yn * gout_ref[...] + bout_ref[...]).astype(o_ref.dtype)


@functools.partial(jax.jit, static_argnames=("tile_m",))
def decoder_graph_forward(x, params, tile_m=256):
    """x: (B, T, N, C_in) -> (B, T, N, C_out). Eval-mode forward."""
    b, t, n, c_in = x.shape
    gin, bin_, w1, b1, w2, b2, gout, bout = params
    hidden = w1.shape[1]
    c_out = w2.shape[1]
    m = b * t * n

    # Fold the input LayerNorm affine into the first Linear (exact algebra):
    #   (xn*g + beta) @ W1 + b1 == xn @ (g[:,None]*W1) + (beta @ W1 + b1)
    w1_eff = gin[:, None].astype(jnp.float32) * w1
    b1_eff = b1 + bin_ @ w1

    # bf16 MXU operands: 2x MXU rate and half the weight HBM/VMEM traffic.
    w1_bf = w1_eff.astype(jnp.bfloat16)
    w2_bf = w2.astype(jnp.bfloat16)

    # Per-feature vectors presented as (1, C) rows (lane axis), kept f32.
    b1_2 = b1_eff.reshape(1, hidden).astype(jnp.float32)
    b2_2 = b2.reshape(1, c_out).astype(jnp.float32)
    gout2 = gout.reshape(1, c_out).astype(jnp.float32)
    bout2 = bout.reshape(1, c_out).astype(jnp.float32)

    # Row tiling: big tiles amortize the ~0.35us per-grid-step overhead and
    # feed the MXU; pad row count instead of asserting divisibility.
    x2d = x.reshape(m, c_in)
    tm = min(tile_m, _round_up(m, 8))
    m_pad = pl.cdiv(m, tm) * tm
    if m_pad != m:
        x2d = jnp.pad(x2d, ((0, m_pad - m), (0, 0)))
    grid = (m_pad // tm,)

    row_spec = pl.BlockSpec((tm, c_in), lambda i: (i, 0))
    full = lambda shape: pl.BlockSpec(shape, lambda i: (0, 0))

    cost = pl.CostEstimate(
        flops=2 * m_pad * (c_in * hidden + hidden * c_out)
              + 10 * m_pad * (c_in + c_out),
        transcendentals=2 * m_pad,                 # two rsqrt per row
        bytes_accessed=(m_pad * c_in * 4 + m_pad * c_out * 4
                        + w1_bf.size * 2 + w2_bf.size * 2
                        + 4 * (hidden + 3 * c_out)),
    )

    # VMEM budget: double-buffered I/O row tiles + weights + bf16 scratch +
    # headroom. Clamped to [32 MiB, 64 MiB] so the request never drops below
    # the scoped default and stays legal on v7x (64 MiB physical VMEM).
    vmem_need = (2 * tm * (c_in + c_out) * 4
                 + 2 * 2 * (c_in * hidden + hidden * c_out)
                 + 2 * 4 * (hidden + 3 * c_out)
                 + tm * hidden * 2
                 + (2 << 20))
    vmem_limit = int(min(max(vmem_need, 32 << 20), 64 << 20))

    out2d = pl.pallas_call(
        _decoder_graph_kernel,
        out_shape=jax.ShapeDtypeStruct((m_pad, c_out), x.dtype),
        grid_spec=pltpu.PrefetchScalarGridSpec(
            num_scalar_prefetch=0,
            grid=grid,
            in_specs=[
                row_spec,                        # x row tile
                full((c_in, hidden)),            # W1 (LN-in affine folded, bf16)
                full((1, hidden)),               # b1 (folded, f32)
                full((hidden, c_out)),           # W2 (bf16)
                full((1, c_out)),                # b2
                full((1, c_out)),                # ln_out gamma
                full((1, c_out)),                # ln_out beta
            ],
            out_specs=pl.BlockSpec((tm, c_out), lambda i: (i, 0)),
            scratch_shapes=[pltpu.VMEM((tm, hidden), jnp.bfloat16)],
        ),
        compiler_params=pltpu.CompilerParams(
            dimension_semantics=("parallel",),
            vmem_limit_bytes=vmem_limit),
        cost_estimate=cost,
    )(x2d, w1_bf, b1_2, w2_bf, b2_2, gout2, bout2)

    return out2d[:m].reshape(b, t, n, c_out)


def init_params(key, in_channels, hidden_channels, out_channels):
    k1, k2, k3, k4 = jax.random.split(key, 4)
    # LayerNorm params (PyTorch default: weight=1, bias=0)
    gin = jnp.ones((in_channels,), jnp.float32)
    bin_ = jnp.zeros((in_channels,), jnp.float32)
    gout = jnp.ones((out_channels,), jnp.float32)
    bout = jnp.zeros((out_channels,), jnp.float32)
    # Linear params, uniform init like nn.Linear
    lim1 = 1.0 / (in_channels ** 0.5)
    w1 = jax.random.uniform(k1, (in_channels, hidden_channels), jnp.float32,
                            minval=-lim1, maxval=lim1)
    b1 = jax.random.uniform(k2, (hidden_channels,), jnp.float32,
                            minval=-lim1, maxval=lim1)
    lim2 = 1.0 / (hidden_channels ** 0.5)
    w2 = jax.random.uniform(k3, (hidden_channels, out_channels), jnp.float32,
                            minval=-lim2, maxval=lim2)
    b2 = jax.random.uniform(k4, (out_channels,), jnp.float32,
                            minval=-lim2, maxval=lim2)
    return (gin, bin_, w1, b1, w2, b2, gout, bout)


def _reference_forward(x, params):
    """Pure-JAX f32 reference mirroring PyTorch DecoderGraph.forward (eval)."""
    gin, bin_, w1, b1, w2, b2, gout, bout = params
    b, t, n, c = x.shape
    xr = x.reshape(-1, c).astype(jnp.float32)

    def ln(v, g, beta):
        mu = v.mean(-1, keepdims=True)
        var = ((v - mu) ** 2).mean(-1, keepdims=True)
        return (v - mu) / jnp.sqrt(var + 1e-5) * g + beta

    h = jnp.maximum(ln(xr, gin, bin_) @ w1 + b1, 0.0)
    y = ln(h @ w2 + b2, gout, bout)
    return y.reshape(b, t, n, -1)


def _reference_forward_matched(x, params):
    """Reference replicating the kernel's exact precision choices
    (folded LN-in affine, bf16 MXU operands, bf16-staged intermediate)."""
    gin, bin_, w1, b1, w2, b2, gout, bout = params
    b, t, n, c = x.shape
    xr = x.reshape(-1, c).astype(jnp.float32)

    mu = xr.mean(-1, keepdims=True)
    xc = xr - mu
    var = (xc * xc).mean(-1, keepdims=True)
    xn = xc * jax.lax.rsqrt(var + 1e-5)

    w1_bf = (gin[:, None] * w1).astype(jnp.bfloat16)
    b1_eff = b1 + bin_ @ w1
    h = jnp.dot(xn.astype(jnp.bfloat16), w1_bf,
                preferred_element_type=jnp.float32) + b1_eff
    h = jnp.maximum(h, 0.0).astype(jnp.bfloat16)

    y = jnp.dot(h, w2.astype(jnp.bfloat16),
                preferred_element_type=jnp.float32) + b2

    mu2 = y.mean(-1, keepdims=True)
    yc = y - mu2
    var2 = (yc * yc).mean(-1, keepdims=True)
    yn = yc * jax.lax.rsqrt(var2 + 1e-5)
    return (yn * gout + bout).reshape(b, t, n, -1)


if __name__ == "__main__":
    key = jax.random.PRNGKey(0)
    in_channels, hidden_channels, out_channels = 32, 64, 16
    B, T, N = 2, 4, 8

    kp, kx = jax.random.split(key)
    params = init_params(kp, in_channels, hidden_channels, out_channels)
    x = jax.random.normal(kx, (B, T, N, in_channels), jnp.float32)

    out = decoder_graph_forward(x, params)
    jax.block_until_ready(out)
    assert out.shape == (B, T, N, out_channels)

    # Tight check vs. a reference matching the kernel's precision choices.
    ref_matched = _reference_forward_matched(x, params)
    assert jnp.allclose(out, ref_matched, atol=2e-3, rtol=2e-3), \
        "mismatch vs matched-precision reference"

    # Loose check vs. the pure-f32 PyTorch-equivalent forward; slack covers
    # bf16 rounding of the MXU operands.
    ref_f32 = _reference_forward(x, params)
    assert jnp.allclose(out, ref_f32, atol=5e-2, rtol=5e-2), \
        "mismatch vs f32 reference"

    print("KERNEL_OK")
</pallas_src>

<mosaic_0001>
module attributes {stable_mosaic.version = 11 : i64} {
  func.func @_decoder_graph_kernel(%arg0: i32, %arg1: memref<64x32xf32, #tpu.memory_space<vmem>>, %arg2: memref<32x64xbf16, #tpu.memory_space<vmem>>, %arg3: memref<1x64xf32, #tpu.memory_space<vmem>>, %arg4: memref<64x16xbf16, #tpu.memory_space<vmem>>, %arg5: memref<1x16xf32, #tpu.memory_space<vmem>>, %arg6: memref<1x16xf32, #tpu.memory_space<vmem>>, %arg7: memref<1x16xf32, #tpu.memory_space<vmem>>, %arg8: memref<64x16xf32, #tpu.memory_space<vmem>>, %arg9: memref<64x64xbf16, #tpu.memory_space<vmem>>) attributes {dimension_semantics = [#tpu.dimension_semantics<parallel>], iteration_bounds = array<i64: 1>, scalar_prefetch = 0 : i64, scratch_operands = 1 : i64, tpu.core_type = #tpu.core_type<tc>, window_params = [{transform_indices = @transform_0, window_bounds = array<i64: 64, 32>}, {pipeline_mode = #tpu.pipeline_mode<synchronous>, transform_indices = @transform_1, window_bounds = array<i64: 32, 64>}, {pipeline_mode = #tpu.pipeline_mode<synchronous>, transform_indices = @transform_2, window_bounds = array<i64: 1, 64>}, {pipeline_mode = #tpu.pipeline_mode<synchronous>, transform_indices = @transform_3, window_bounds = array<i64: 64, 16>}, {pipeline_mode = #tpu.pipeline_mode<synchronous>, transform_indices = @transform_4, window_bounds = array<i64: 1, 16>}, {pipeline_mode = #tpu.pipeline_mode<synchronous>, transform_indices = @transform_5, window_bounds = array<i64: 1, 16>}, {pipeline_mode = #tpu.pipeline_mode<synchronous>, transform_indices = @transform_6, window_bounds = array<i64: 1, 16>}, {transform_indices = @transform_7, window_bounds = array<i64: 64, 16>}]} {
    %c0 = arith.constant 0 : index
    %c0_0 = arith.constant 0 : index
    %0 = vector.load %arg1[%c0, %c0_0] : memref<64x32xf32, #tpu.memory_space<vmem>>, vector<64x32xf32>
    %cst = arith.constant dense<0.000000e+00> : vector<64xf32>
    %1 = vector.multi_reduction <add>, %0, %cst [1] : vector<64x32xf32> to vector<64xf32>
    %2 = vector.shape_cast %1 : vector<64xf32> to vector<64x1xf32>
    %cst_1 = arith.constant 3.200000e+01 : f32
    %3 = vector.broadcast %cst_1 : f32 to vector<64x1xf32>
    %4 = arith.divf %2, %3 : vector<64x1xf32>
    %5 = vector.broadcast %4 : vector<64x1xf32> to vector<64x32xf32>
    %6 = arith.subf %0, %5 : vector<64x32xf32>
    %7 = arith.mulf %6, %6 : vector<64x32xf32>
    %cst_2 = arith.constant dense<0.000000e+00> : vector<64xf32>
    %8 = vector.multi_reduction <add>, %7, %cst_2 [1] : vector<64x32xf32> to vector<64xf32>
    %9 = vector.shape_cast %8 : vector<64xf32> to vector<64x1xf32>
    %cst_3 = arith.constant 3.200000e+01 : f32
    %10 = vector.broadcast %cst_3 : f32 to vector<64x1xf32>
    %11 = arith.divf %9, %10 : vector<64x1xf32>
    %cst_4 = arith.constant 9.99999974E-6 : f32
    %12 = vector.broadcast %cst_4 : f32 to vector<64x1xf32>
    %13 = arith.addf %11, %12 : vector<64x1xf32>
    %14 = math.rsqrt %13 : vector<64x1xf32>
    %15 = vector.broadcast %14 : vector<64x1xf32> to vector<64x32xf32>
    %16 = arith.mulf %6, %15 : vector<64x32xf32>
    %17 = arith.truncf %16 : vector<64x32xf32> to vector<64x32xbf16>
    %c0_5 = arith.constant 0 : index
    %c0_6 = arith.constant 0 : index
    %18 = vector.load %arg2[%c0_5, %c0_6] : memref<32x64xbf16, #tpu.memory_space<vmem>>, vector<32x64xbf16>
    %cst_7 = arith.constant dense<0.000000e+00> : vector<64x64xf32>
    %19 = tpu.matmul %17, %18, %cst_7 {dimension_numbers = #tpu.dot_dimension_numbers<[1], [0], [0], [1], [0, 0, 1, 1], [], []>} : vector<64x32xbf16>, vector<32x64xbf16>, vector<64x64xf32> -> vector<64x64xf32>
    %c0_8 = arith.constant 0 : index
    %c0_9 = arith.constant 0 : index
    %20 = vector.load %arg3[%c0_8, %c0_9] : memref<1x64xf32, #tpu.memory_space<vmem>>, vector<1x64xf32>
    %21 = vector.broadcast %20 : vector<1x64xf32> to vector<64x64xf32>
    %22 = arith.addf %19, %21 : vector<64x64xf32>
    %cst_10 = arith.constant 0.000000e+00 : f32
    %23 = vector.broadcast %cst_10 : f32 to vector<64x64xf32>
    %24 = arith.maximumf %22, %23 : vector<64x64xf32>
    %25 = arith.truncf %24 : vector<64x64xf32> to vector<64x64xbf16>
    %c0_11 = arith.constant 0 : index
    %c0_12 = arith.constant 0 : index
    %26 = vector.load %arg9[%c0_11, %c0_12] : memref<64x64xbf16, #tpu.memory_space<vmem>>, vector<64x64xbf16>
    tpu.vector_store %arg9[%c0_11, %c0_12], %25 {strides = array<i32>} : memref<64x64xbf16, #tpu.memory_space<vmem>>, vector<64x64xbf16>,
    %c0_13 = arith.constant 0 : index
    %c0_14 = arith.constant 0 : index
    %27 = vector.load %arg9[%c0_13, %c0_14] : memref<64x64xbf16, #tpu.memory_space<vmem>>, vector<64x64xbf16>
    %c0_15 = arith.constant 0 : index
    %c0_16 = arith.constant 0 : index
    %28 = vector.load %arg4[%c0_15, %c0_16] : memref<64x16xbf16, #tpu.memory_space<vmem>>, vector<64x16xbf16>
    %cst_17 = arith.constant dense<0.000000e+00> : vector<64x16xf32>
    %29 = tpu.matmul %27, %28, %cst_17 {dimension_numbers = #tpu.dot_dimension_numbers<[1], [0], [0], [1], [0, 0, 1, 1], [], []>} : vector<64x64xbf16>, vector<64x16xbf16>, vector<64x16xf32> -> vector<64x16xf32>
    %c0_18 = arith.constant 0 : index
    %c0_19 = arith.constant 0 : index
    %30 = vector.load %arg5[%c0_18, %c0_19] : memref<1x16xf32, #tpu.memory_space<vmem>>, vector<1x16xf32>
    %31 = vector.broadcast %30 : vector<1x16xf32> to vector<64x16xf32>
    %32 = arith.addf %29, %31 : vector<64x16xf32>
    %cst_20 = arith.constant dense<0.000000e+00> : vector<64xf32>
    %33 = vector.multi_reduction <add>, %32, %cst_20 [1] : vector<64x16xf32> to vector<64xf32>
    %34 = vector.shape_cast %33 : vector<64xf32> to vector<64x1xf32>
    %cst_21 = arith.constant 1.600000e+01 : f32
    %35 = vector.broadcast %cst_21 : f32 to vector<64x1xf32>
    %36 = arith.divf %34, %35 : vector<64x1xf32>
    %37 = vector.broadcast %36 : vector<64x1xf32> to vector<64x16xf32>
    %38 = arith.subf %32, %37 : vector<64x16xf32>
    %39 = arith.mulf %38, %38 : vector<64x16xf32>
    %cst_22 = arith.constant dense<0.000000e+00> : vector<64xf32>
    %40 = vector.multi_reduction <add>, %39, %cst_22 [1] : vector<64x16xf32> to vector<64xf32>
    %41 = vector.shape_cast %40 : vector<64xf32> to vector<64x1xf32>
    %cst_23 = arith.constant 1.600000e+01 : f32
    %42 = vector.broadcast %cst_23 : f32 to vector<64x1xf32>
    %43 = arith.divf %41, %42 : vector<64x1xf32>
    %cst_24 = arith.constant 9.99999974E-6 : f32
    %44 = vector.broadcast %cst_24 : f32 to vector<64x1xf32>
    %45 = arith.addf %43, %44 : vector<64x1xf32>
    %46 = math.rsqrt %45 : vector<64x1xf32>
    %47 = vector.broadcast %46 : vector<64x1xf32> to vector<64x16xf32>
    %48 = arith.mulf %38, %47 : vector<64x16xf32>
    %c0_25 = arith.constant 0 : index
    %c0_26 = arith.constant 0 : index
    %49 = vector.load %arg6[%c0_25, %c0_26] : memref<1x16xf32, #tpu.memory_space<vmem>>, vector<1x16xf32>
    %50 = vector.broadcast %49 : vector<1x16xf32> to vector<64x16xf32>
    %51 = arith.mulf %48, %50 : vector<64x16xf32>
    %c0_27 = arith.constant 0 : index
    %c0_28 = arith.constant 0 : index
    %52 = vector.load %arg7[%c0_27, %c0_28] : memref<1x16xf32, #tpu.memory_space<vmem>>, vector<1x16xf32>
    %53 = vector.broadcast %52 : vector<1x16xf32> to vector<64x16xf32>
    %54 = arith.addf %51, %53 : vector<64x16xf32>
    %c0_29 = arith.constant 0 : index
    %c0_30 = arith.constant 0 : index
    %55 = vector.load %arg8[%c0_29, %c0_30] : memref<64x16xf32, #tpu.memory_space<vmem>>, vector<64x16xf32>
    tpu.vector_store %arg8[%c0_29, %c0_30], %54 {strides = array<i32>} : memref<64x16xf32, #tpu.memory_space<vmem>>, vector<64x16xf32>,
    return
  }
  func.func @transform_0(%arg0: i32) -> (i32, i32) {
    %c0_i32 = arith.constant 0 : i32
    %c0_i32_0 = arith.constant 0 : i32
    return %arg0, %c0_i32 : i32, i32
  }
  func.func @transform_1(%arg0: i32) -> (i32, i32) {
    %c0_i32 = arith.constant 0 : i32
    %c0_i32_0 = arith.constant 0 : i32
    %c0_i32_1 = arith.constant 0 : i32
    return %c0_i32, %c0_i32_0 : i32, i32
  }
  func.func @transform_2(%arg0: i32) -> (i32, i32) {
    %c0_i32 = arith.constant 0 : i32
    %c0_i32_0 = arith.constant 0 : i32
    %c0_i32_1 = arith.constant 0 : i32
    return %c0_i32, %c0_i32_0 : i32, i32
  }
  func.func @transform_3(%arg0: i32) -> (i32, i32) {
    %c0_i32 = arith.constant 0 : i32
    %c0_i32_0 = arith.constant 0 : i32
    %c0_i32_1 = arith.constant 0 : i32
    return %c0_i32, %c0_i32_0 : i32, i32
  }
  func.func @transform_4(%arg0: i32) -> (i32, i32) {
    %c0_i32 = arith.constant 0 : i32
    %c0_i32_0 = arith.constant 0 : i32
    %c0_i32_1 = arith.constant 0 : i32
    return %c0_i32, %c0_i32_0 : i32, i32
  }
  func.func @transform_5(%arg0: i32) -> (i32, i32) {
    %c0_i32 = arith.constant 0 : i32
    %c0_i32_0 = arith.constant 0 : i32
    %c0_i32_1 = arith.constant 0 : i32
    return %c0_i32, %c0_i32_0 : i32, i32
  }
  func.func @transform_6(%arg0: i32) -> (i32, i32) {
    %c0_i32 = arith.constant 0 : i32
    %c0_i32_0 = arith.constant 0 : i32
    %c0_i32_1 = arith.constant 0 : i32
    return %c0_i32, %c0_i32_0 : i32, i32
  }
  func.func @transform_7(%arg0: i32) -> (i32, i32) {
    %c0_i32 = arith.constant 0 : i32
    %c0_i32_0 = arith.constant 0 : i32
    return %arg0, %c0_i32 : i32, i32
  }
}

</mosaic_0001>

<bundles_post_ra>
// kernel: decoder_graph_forward.1
= control target key start
LH: loop header
LB: loop body
LE: loop exit
PB: predicated region body
PF: predicated region fallthrough
CT: control target
= control target key end

     0   :  { %vm36_vm0 = vcmask 261120   ;;  %s909_s0 = inlined_call_operand.vmem [shape: f32[64,32], index: 0, kind: input, shape index: {}]   ;;  %s910_s1 = inlined_call_operand.vmem [shape: bf16[32,64], index: 1, kind: input, shape index: {}]   ;;  %s911_s2 = inlined_call_operand.vmem [shape: f32[1,64], index: 2, kind: input, shape index: {}]   ;;  %s912_s3 = inlined_call_operand.vmem [shape: bf16[64,16], index: 3, kind: input, shape index: {}]   ;;  %s913_s4 = inlined_call_operand.vmem [shape: f32[1,16], index: 4, kind: input, shape index: {}]   ;;  %s914_s5 = inlined_call_operand.vmem [shape: f32[1,16], index: 5, kind: input, shape index: {}]   ;;  %s915_s6 = inlined_call_operand.vmem [shape: f32[1,16], index: 6, kind: input, shape index: {}]   ;;  %s916_s7 = inlined_call_operand.hbm [shape: f32[64,16], index: 7, kind: output, shape index: {}]  }
   0x1   :  { %v28_v0 = vld [vmem:[%s909_s0] sm:$0xff]  ;;  %v30_v1 = vld [vmem:[%s909_s0 + $0x10] sm:$0xff]  ;;  %v29_v2 = vld [vmem:[%s909_s0 + $0x8] sm:$0xff] }
   0x2   :  { %v37_v3 = vsel %vm36_vm0, %v28_v0, 0.0  ;;  %v43_v4 = vsel %vm36_vm0, %v30_v1, 0.0  ;;  %v31_v5 = vld [vmem:[%s909_s0 + $0x18] sm:$0xff]  ;;  %v40_v6 = vsel %vm36_vm0, %v29_v2, 0.0  ;;  %v32_v7 = vld [vmem:[%s909_s0 + $0x20] sm:$0xff]  ;;  %v33_v9 = vld [vmem:[%s909_s0 + $0x28] sm:$0xff] }
   0x3   :  { %38 = vadd.xlane.f32.xlu0 %v37_v3  ;;  %44 = vadd.xlane.f32.xlu1 %v43_v4  ;;  %v46_v8 = vsel %vm36_vm0, %v31_v5, 0.0  ;;  %v49_v10 = vsel %vm36_vm0, %v32_v7, 0.0  ;;  %v52_v11 = vsel %vm36_vm0, %v33_v9, 0.0 }
   0x7   :  { %41 = vadd.xlane.f32.xlu0 %v40_v6  ;;  %47 = vadd.xlane.f32.xlu1 %v46_v8 }
   0x8   :  { %12 = vsyncpa [#allocation4], 0  ;;  %v34_v12 = vld [vmem:[%s909_s0 + $0x30] sm:$0xff]  ;;  %v35_v13 = vld [vmem:[%s909_s0 + $0x38] sm:$0xff]  ;;  %vm258_vm1 = vcmask 523264   ;;  %vm383_vm2 = vcmask 130048  }
   0x9   :  { %v55_v14 = vsel %vm36_vm0, %v34_v12, 0.0  ;;  %v58_v15 = vsel %vm36_vm0, %v35_v13, 0.0  ;;  %v606_v56 = vld [vmem:[%s910_s1] sm:$0xff]   ;;  %v607_v57 = vld [vmem:[%s910_s1 + $0x8] sm:$0xff]  }
   0xa   :  { %575 = vmatprep.subr.bf16.mxu0 %v606_v56 }
   0xb   :  { %50 = vadd.xlane.f32.xlu0 %v49_v10  ;;  %53 = vadd.xlane.f32.xlu1 %v52_v11 }
   0xc   :  { %576 = vmatpush3.bf16.msra.mxu0 %v606_v56 }
   0xd   :  { %577 = vmatprep.subr.bf16.mxu0 %v607_v57 }
   0xf   :  { %56 = vadd.xlane.f32.xlu0 %v55_v14  ;;  %59 = vadd.xlane.f32.xlu1 %v58_v15 }
  0x10   :  { %578 = vmatpush3.bf16.msra.mxu0 %v607_v57 }
  0x90   :  { %v39_v16 = vpop.xlane.xlu0 %38  ;;  %v45_v17 = vpop.xlane.xlu1 %44 }
  0x91   :  { %v62_v18 = vmul.f32 0.03125, %v39_v16  ;;  %v64_v19 = vmul.f32 0.03125, %v45_v17 }
  0x93   :  { %v743_v20 = vsub.f32 %v28_v0, %v62_v18  ;;  %v745_v21 = vsub.f32 %v30_v1, %v64_v19 }
  0x94   :  { %v42_v22 = vpop.xlane.xlu0 %41  ;;  %v48_v23 = vpop.xlane.xlu1 %47 }
  0x95   :  { %v63_v24 = vmul.f32 0.03125, %v42_v22  ;;  %v65_v25 = vmul.f32 0.03125, %v48_v23  ;;  %v78_v26 = vmul.f32 %v743_v20, %v743_v20  ;;  %v80_v27 = vmul.f32 %v745_v21, %v745_v21 }
  0x97   :  { %v751_v28 = vsub.f32 %v29_v2, %v63_v24  ;;  %v753_v29 = vsub.f32 %v31_v5, %v65_v25  ;;  %v86_v30 = vsel %vm36_vm0, %v78_v26, 0.0  ;;  %v92_v33 = vsel %vm36_vm0, %v80_v27, 0.0 }
  0x98   :  { %87 = vadd.xlane.f32.xlu0 %v86_v30  ;;  %v51_v31 = vpop.xlane.xlu0 %50  ;;  %v54_v32 = vpop.xlane.xlu1 %53 }
  0x99   :  { %v66_v34 = vmul.f32 0.03125, %v51_v31  ;;  %v67_v35 = vmul.f32 0.03125, %v54_v32  ;;  %v79_v36 = vmul.f32 %v751_v28, %v751_v28  ;;  %v81_v37 = vmul.f32 %v753_v29, %v753_v29 }
  0x9b   :  { %v761_v38 = vsub.f32 %v32_v7, %v66_v34  ;;  %v763_v39 = vsub.f32 %v33_v9, %v67_v35  ;;  %v89_v40 = vsel %vm36_vm0, %v79_v36, 0.0  ;;  %v95_v43 = vsel %vm36_vm0, %v81_v37, 0.0 }
  0x9c   :  { %93 = vadd.xlane.f32.xlu0 %v92_v33  ;;  %90 = vadd.xlane.f32.xlu1 %v89_v40  ;;  %v57_v41 = vpop.xlane.xlu0 %56  ;;  %v60_v42 = vpop.xlane.xlu1 %59 }
  0x9d   :  { %v68_v44 = vmul.f32 0.03125, %v57_v41  ;;  %v69_v45 = vmul.f32 0.03125, %v60_v42  ;;  %v82_v46 = vmul.f32 %v761_v38, %v761_v38  ;;  %v83_v47 = vmul.f32 %v763_v39, %v763_v39  ;;  %v611_v41 = vld [vmem:[%s912_s3 + $0x18] sm:$0xff]   ;;  %v543_v42 = vld [vmem:[%s911_s2] ss:$0 sm:$0xff] }
  0x9f   :  { %v771_v48 = vsub.f32 %v34_v12, %v68_v44  ;;  %v773_v49 = vsub.f32 %v35_v13, %v69_v45  ;;  %v98_v50 = vsel %vm36_vm0, %v82_v46, 0.0  ;;  %v101_v51 = vsel %vm36_vm0, %v83_v47, 0.0 }
  0xa0   :  { %96 = vadd.xlane.f32.xlu1 %v95_v43  ;;  %99 = vadd.xlane.f32.xlu0 %v98_v50 }
  0xa1   :  { %v84_v52 = vmul.f32 %v771_v48, %v771_v48  ;;  %v85_v53 = vmul.f32 %v773_v49, %v773_v49 }
  0xa3   :  { %v104_v54 = vsel %vm36_vm0, %v84_v52, 0.0  ;;  %v107_v55 = vsel %vm36_vm0, %v85_v53, 0.0 }
  0xa4   :  { %102 = vadd.xlane.f32.xlu1 %v101_v51  ;;  %105 = vadd.xlane.f32.xlu0 %v104_v54 }
  0xa8   :  { %108 = vadd.xlane.f32.xlu1 %v107_v55 }
 0x125   :  { %v88_v58 = vpop.xlane.xlu0 %87 }
 0x126   :  { %v110_v59 = vmul.f32 0.03125, %v88_v58 }
 0x128   :  { %v118_v60 = vadd.f32 1e-05, %v110_v59 }
 0x129   :  { %v91_v61 = vpop.xlane.xlu1 %90  ;;  %v94_v62 = vpop.xlane.xlu0 %93 }
 0x12a   :  { %v111_v63 = vmul.f32 0.03125, %v91_v61  ;;  %v112_v0 = vmul.f32 0.03125, %v94_v62  ;;  %612 = vrsqrt.f32 %v118_v60 }
 0x12c   :  { %v119_v1 = vadd.f32 1e-05, %v111_v63  ;;  %v120_v2 = vadd.f32 1e-05, %v112_v0 }
 0x12d   :  { %v97_v3 = vpop.xlane.xlu1 %96  ;;  %v100_v4 = vpop.xlane.xlu0 %99 }
 0x12e   :  { %614 = vrsqrt.f32 %v119_v1  ;;  %v113_v5 = vmul.f32 0.03125, %v97_v3  ;;  %v114_v6 = vmul.f32 0.03125, %v100_v4 }
 0x12f   :  { %616 = vrsqrt.f32 %v120_v2 }
 0x130   :  { %v121_v7 = vadd.f32 1e-05, %v113_v5  ;;  %v122_v8 = vadd.f32 1e-05, %v114_v6 }
 0x131   :  { %v103_v9 = vpop.xlane.xlu1 %102  ;;  %v106_v10 = vpop.xlane.xlu0 %105 }
 0x132   :  { %618 = vrsqrt.f32 %v121_v7  ;;  %v115_v11 = vmul.f32 0.03125, %v103_v9  ;;  %v116_v12 = vmul.f32 0.03125, %v106_v10 }
 0x133   :  { %620 = vrsqrt.f32 %v122_v8 }
 0x134   :  { %v123_v13 = vadd.f32 1e-05, %v115_v11  ;;  %v124_v14 = vadd.f32 1e-05, %v116_v12  ;;  %v613_v16 = vpop.eup %612  ;;  %v550_v11 = vld [vmem:[%s913_s4] ss:$0 sm:$0xff] }
 0x135   :  { %v109_v15 = vpop.xlane.xlu1 %108  ;;  %v134_v22 = vmul.f32 %v613_v16, %v743_v20 }
 0x136   :  { %622 = vrsqrt.f32 %v123_v13  ;;  %v117_v17 = vmul.f32 0.03125, %v109_v15 }
 0x137   :  { %624 = vrsqrt.f32 %v124_v14 }
 0x138   :  { %v615_v18 = vpop.eup %614  ;;  %v125_v19 = vadd.f32 1e-05, %v117_v17 }
 0x139   :  { %v135_v23 = vmul.f32 %v615_v18, %v751_v28  ;;  %v617_v24 = vpop.eup %616 }
 0x13a   :  { %626 = vrsqrt.f32 %v125_v19  ;;  %v136_v27 = vmul.f32 %v617_v24, %v745_v21 }
 0x13b   :  { %v142_v25 = vpack.c.bf16 %v135_v23, %v134_v22 }
 0x13c   :  { %v619_v26 = vpop.eup %618 }
 0x13d   :  { %579 = vmatprep.mubr.msk.bf16.mxu0 %vm36_vm0, %v142_v25  ;;  %v137_v30 = vmul.f32 %v619_v26, %v753_v29  ;;  %v621_v31 = vpop.eup %620  ;;  %v608_v29 = vld [vmem:[%s912_s3] sm:$0xff]  }
 0x13e   :  { %v138_v34 = vmul.f32 %v621_v31, %v761_v38  ;;  %587 = vmatprep.subr.bf16.mxu1 %v608_v29  ;;  %v609_v38 = vld [vmem:[%s912_s3 + $0x8] sm:$0xff]  }
 0x13f   :  { %v143_v32 = vpack.c.bf16 %v137_v30, %v136_v27  ;;  %588 = vmatpush3.bf16.msra.mxu1 %v608_v29 }
 0x140   :  { %v623_v33 = vpop.eup %622  ;;  %589 = vmatprep.subr.bf16.mxu1 %v609_v38 }
 0x141   :  { %580 = vmatmul.mubr.msk.bf16.vlgmr.msra.gmra.mrb[0].mxu0 %vm36_vm0, %v143_v32  ;;  %v139_v20 = vmul.f32 %v623_v33, %v763_v39  ;;  %v625_v28 = vpop.eup %624  ;;  %v610_v39 = vld [vmem:[%s912_s3 + $0x10] sm:$0xff]  }
 0x142   :  { %v140_v37 = vmul.f32 %v625_v28, %v771_v48 }
 0x143   :  { %v144_v35 = vpack.c.bf16 %v139_v20, %v138_v34  ;;  %590 = vmatpush3.bf16.msra.mxu1 %v609_v38 }
 0x144   :  { %v627_v36 = vpop.eup %626  ;;  %591 = vmatprep.subr.bf16.mxu1 %v610_v39 }
 0x145   :  { %583 = vmatprep.mubr.msk.bf16.mxu0 %vm36_vm0, %v144_v35  ;;  %v141_v21 = vmul.f32 %v627_v36, %v773_v49 }
 0x147   :  { %v145_v40 = vpack.c.bf16 %v141_v21, %v140_v37  ;;  %592 = vmatpush3.bf16.msra.mxu1 %v610_v39 }
 0x148   :  { %593 = vmatprep.subr.bf16.mxu1 %v611_v41 }
 0x149   :  { %584 = vmatmul.mubr.msk.bf16.gmra.mrb[4].mxu0 %vm36_vm0, %v145_v40 }
 0x14b   :  { %594 = vmatpush3.bf16.msra.mxu1 %v611_v41 }
 0x214   :  { %v581_v43 = vpop.f32.mrb[0].mxu0 }
 0x215   :  { %v224_v44 = vadd.f32 %v581_v43, %v543_v42  ;;  %v215_v45 = vpop.f32.mrb[1].mxu0 }
 0x216   :  { %v216_v46 = vadd.f32 %v543_v42, %v215_v45  ;;  %v582_v47 = vpop.f32.mrb[2].mxu0 }
 0x217   :  { %v227_v48 = vadd.f32 %v582_v47, %v543_v42  ;;  %v218_v49 = vpop.f32.mrb[3].mxu0  ;;  %v248_v51 = vmax.f32 %v224_v44, 0.0 }
 0x218   :  { %v219_v50 = vadd.f32 %v543_v42, %v218_v49  ;;  %v246_v53 = vmax.f32 %v216_v46, 0.0 }
 0x219   :  { %v249_v52 = vmax.f32 %v227_v48, 0.0 }
 0x21a   :  { %v247_v54 = vmax.f32 %v219_v50, 0.0 }
 0x21b   :  { %v255_v55 = vpack.c.bf16 %v249_v52, %v248_v51 }
 0x21c   :  { %v254_v56 = vpack.c.bf16 %v247_v54, %v246_v53  ;;  %v585_v57 = vpop.f32.mrb[4].mxu0 }
 0x21d   :  { %260 = vst.msk [vmem:[#allocation2 + $0x8] sm:$0xff] %vm258_vm1, %v255_v55  ;;  %v240_v58 = vadd.f32 %v585_v57, %v543_v42  ;;  %v231_v59 = vpop.f32.mrb[5].mxu0 }
 0x21e   :  { %259 = vst.msk [vmem:[#allocation2] sm:$0xff] %vm258_vm1, %v254_v56  ;;  %v232_v60 = vadd.f32 %v543_v42, %v231_v59  ;;  %v586_v61 = vpop.f32.mrb[6].mxu0 }
 0x21f   :  { %v243_v62 = vadd.f32 %v586_v61, %v543_v42  ;;  %v234_v63 = vpop.f32.mrb[7].mxu0  ;;  %v252_v1 = vmax.f32 %v240_v58, 0.0 }
 0x220   :  { %v235_v0 = vadd.f32 %v543_v42, %v234_v63  ;;  %v250_v3 = vmax.f32 %v232_v60, 0.0 }
 0x221   :  { %v253_v2 = vmax.f32 %v243_v62, 0.0 }
 0x222   :  { %v251_v4 = vmax.f32 %v235_v0, 0.0 }
 0x223   :  { %v257_v5 = vpack.c.bf16 %v253_v2, %v252_v1 }
 0x224   :  { %v256_v6 = vpack.c.bf16 %v251_v4, %v250_v3  ;;  %v264_v8 = vld [vmem:[#allocation2 + $0x8] sm:$0xff] }
 0x225   :  { %262 = vst.msk [vmem:[#allocation2 + $0x18] sm:$0xff] %vm258_vm1, %v257_v5  ;;  %v263_v7 = vld [vmem:[#allocation2] sm:$0xff] }
 0x226   :  { %261 = vst.msk [vmem:[#allocation2 + $0x10] sm:$0xff] %vm258_vm1, %v256_v6  ;;  %595 = vmatprep.mubr.msk.bf16.mxu1 %vm258_vm1, %v263_v7 }
 0x227   :  { %596 = vmatmul.mubr.msk.bf16.vlgmr.msra.gmra.mrb[0].mxu1 %vm258_vm1, %v264_v8 }
 0x22c   :  { %v266_v10 = vld [vmem:[#allocation2 + $0x18] sm:$0xff] }
 0x22d   :  { %v265_v9 = vld [vmem:[#allocation2 + $0x10] sm:$0xff] }
 0x22e   :  { %599 = vmatprep.mubr.msk.bf16.mxu1 %vm258_vm1, %v265_v9 }
 0x22f   :  { %600 = vmatmul.mubr.msk.bf16.gmra.mrb[4].mxu1 %vm258_vm1, %v266_v10 }
 0x2fa   :  { %v597_v12 = vpop.f32.mrb[0].mxu1 }
 0x2fb   :  { %v361_v13 = vadd.f32 %v597_v12, %v550_v11  ;;  %v352_v14 = vpop.f32.mrb[1].mxu1 }
 0x2fc   :  { %v598_v15 = vpop.f32.mrb[2].mxu1  ;;  %v353_v16 = vadd.f32 %v550_v11, %v352_v14 }
 0x2fd   :  { %v364_v17 = vadd.f32 %v598_v15, %v550_v11  ;;  %v355_v18 = vpop.f32.mrb[3].mxu1  ;;  %v390_v19 = vsel %vm383_vm2, %v361_v13, 0.0 }
 0x2fe   :  { %391 = vadd.xlane.f32.xlu0 %v390_v19  ;;  %v356_v22 = vadd.f32 %v550_v11, %v355_v18  ;;  %v384_v24 = vsel %vm383_vm2, %v353_v16, 0.0 }
 0x2ff   :  { %v393_v23 = vsel %vm383_vm2, %v364_v17, 0.0 }
 0x300   :  { %394 = vadd.xlane.f32.xlu1 %v393_v23  ;;  %v387_v27 = vsel %vm383_vm2, %v356_v22, 0.0 }
 0x302   :  { %385 = vadd.xlane.f32.xlu0 %v384_v24  ;;  %v601_v25 = vpop.f32.mrb[4].mxu1 }
 0x303   :  { %v368_v26 = vpop.f32.mrb[5].mxu1  ;;  %v377_v33 = vadd.f32 %v601_v25, %v550_v11 }
 0x304   :  { %v369_v30 = vadd.f32 %v550_v11, %v368_v26  ;;  %388 = vadd.xlane.f32.xlu1 %v387_v27  ;;  %v602_v31 = vpop.f32.mrb[6].mxu1 }
 0x305   :  { %v371_v32 = vpop.f32.mrb[7].mxu1  ;;  %v380_v28 = vadd.f32 %v602_v31, %v550_v11  ;;  %v402_v36 = vsel %vm383_vm2, %v377_v33, 0.0 }
 0x306   :  { %v372_v34 = vadd.f32 %v550_v11, %v371_v32  ;;  %v396_v20 = vsel %vm383_vm2, %v369_v30, 0.0 }
 0x307   :  { %397 = vadd.xlane.f32.xlu0 %v396_v20  ;;  %v405_v37 = vsel %vm383_vm2, %v380_v28, 0.0 }
 0x308   :  { %v399_v35 = vsel %vm383_vm2, %v372_v34, 0.0 }
 0x309   :  { %400 = vadd.xlane.f32.xlu1 %v399_v35  ;;  %v559_v35 = vld [vmem:[%s914_s5] ss:$0 sm:$0xff]  ;;  %s668_s5 = smov [#allocation3]  }
 0x30b   :  { %403 = vadd.xlane.f32.xlu0 %v402_v36 }
 0x30d   :  { %406 = vadd.xlane.f32.xlu1 %v405_v37 }
 0x38b   :  { %v392_v21 = vpop.xlane.xlu0 %391 }
 0x38c   :  { %v411_v40 = vmul.f32 0.0625, %v392_v21 }
 0x38d   :  { %v395_v29 = vpop.xlane.xlu1 %394 }
 0x38e   :  { %v835_v38 = vsub.f32 %v361_v13, %v411_v40  ;;  %v412_v39 = vmul.f32 0.0625, %v395_v29 }
 0x38f   :  { %v386_v41 = vpop.xlane.xlu0 %385 }
 0x390   :  { %v837_v42 = vsub.f32 %v364_v17, %v412_v39  ;;  %v409_v43 = vmul.f32 0.0625, %v386_v41  ;;  %v427_v44 = vmul.f32 %v835_v38, %v835_v38  ;;  %v560_v39 = vld [vmem:[%s915_s6] ss:$0 sm:$0xff]  ;;  %s532_s6 = sshll.u32 %s668_s5, 4  ;;  %s533_s6 = int_to_ptr.vmem [resolvable:$true] %s532_s6 }
 0x391   :  { %v389_v45 = vpop.xlane.xlu1 %388  ;;  %s644_s9 = scalar_lea.vmem %s533_s6, 1024  ;;  %p649_p1 = scmp.lt.s32.totalorder %s533_s6, %s533_s6 }
 0x392   :  { %v841_v46 = vsub.f32 %v353_v16, %v409_v43  ;;  %v410_v47 = vmul.f32 0.0625, %v389_v45  ;;  %v439_v48 = vsel %vm383_vm2, %v427_v44, 0.0  ;;  %v428_v49 = vmul.f32 %v837_v42, %v837_v42  ;;  %p645_p0 = scmp.ne.s32.totalorder %s533_s6, %s644_s9  ;;  %p650_p2 = scmp.lt.s32.totalorder %s644_s9, %s644_s9 }
 0x393   :  { %440 = vadd.xlane.f32.xlu0 %v439_v48 }
 0x394   :  { %v846_v50 = vsub.f32 %v356_v22, %v410_v47  ;;  %v398_v51 = vpop.xlane.xlu0 %397  ;;  %v442_v52 = vsel %vm383_vm2, %v428_v49, 0.0  ;;  %v425_v53 = vmul.f32 %v841_v46, %v841_v46  ;;  %p651_p3 = por %p650_p2, %p649_p1 }
 0x395   :  { %v413_v54 = vmul.f32 0.0625, %v398_v51  ;;  %443 = vadd.xlane.f32.xlu1 %v442_v52 }
 0x396   :  { %v401_v55 = vpop.xlane.xlu1 %400  ;;  %v433_v56 = vsel %vm383_vm2, %v425_v53, 0.0  ;;  %v426_v57 = vmul.f32 %v846_v50, %v846_v50  ;;  %p652_p4 = pnand %p651_p3, %p645_p0 }
 0x397   :  { %v854_v58 = vsub.f32 %v369_v30, %v413_v54  ;;  %v414_v59 = vmul.f32 0.0625, %v401_v55  ;;  %434 = vadd.xlane.f32.xlu0 %v433_v56 }
 0x398   :  { %v404_v60 = vpop.xlane.xlu0 %403  ;;  %v436_v61 = vsel %vm383_vm2, %v426_v57, 0.0 }
 0x399   :  { %v857_v62 = vsub.f32 %v372_v34, %v414_v59  ;;  %v415_v63 = vmul.f32 0.0625, %v404_v60  ;;  %437 = vadd.xlane.f32.xlu1 %v436_v61  ;;  %v429_v0 = vmul.f32 %v854_v58, %v854_v58 }
 0x39a   :  { %v407_v1 = vpop.xlane.xlu1 %406 }
 0x39b   :  { %v861_v2 = vsub.f32 %v377_v33, %v415_v63  ;;  %v416_v3 = vmul.f32 0.0625, %v407_v1  ;;  %v445_v4 = vsel %vm383_vm2, %v429_v0, 0.0  ;;  %v430_v5 = vmul.f32 %v857_v62, %v857_v62 }
 0x39c   :  { %446 = vadd.xlane.f32.xlu0 %v445_v4 }
 0x39d   :  { %v866_v6 = vsub.f32 %v380_v28, %v416_v3  ;;  %v448_v7 = vsel %vm383_vm2, %v430_v5, 0.0  ;;  %v431_v8 = vmul.f32 %v861_v2, %v861_v2 }
 0x39e   :  { %449 = vadd.xlane.f32.xlu1 %v448_v7 }
 0x39f   :  { %v451_v9 = vsel %vm383_vm2, %v431_v8, 0.0  ;;  %v432_v10 = vmul.f32 %v866_v6, %v866_v6 }
 0x3a0   :  { %452 = vadd.xlane.f32.xlu0 %v451_v9 }
 0x3a1   :  { %v454_v11 = vsel %vm383_vm2, %v432_v10, 0.0 }
 0x3a2   :  { %455 = vadd.xlane.f32.xlu1 %v454_v11 }
 0x420   :  { %v441_v12 = vpop.xlane.xlu0 %440 }
 0x421   :  { %v459_v13 = vmul.f32 0.0625, %v441_v12 }
 0x422   :  { %v444_v14 = vpop.xlane.xlu1 %443 }
 0x423   :  { %v467_v15 = vadd.f32 1e-05, %v459_v13  ;;  %v460_v16 = vmul.f32 0.0625, %v444_v14 }
 0x424   :  { %v435_v17 = vpop.xlane.xlu0 %434 }
 0x425   :  { %628 = vrsqrt.f32 %v467_v15  ;;  %v468_v18 = vadd.f32 1e-05, %v460_v16  ;;  %v457_v19 = vmul.f32 0.0625, %v435_v17 }
 0x426   :  { %v438_v22 = vpop.xlane.xlu1 %437 }
 0x427   :  { %630 = vrsqrt.f32 %v468_v18  ;;  %v465_v23 = vadd.f32 1e-05, %v457_v19  ;;  %v458_v24 = vmul.f32 0.0625, %v438_v22 }
 0x429   :  { %632 = vrsqrt.f32 %v465_v23  ;;  %v466_v25 = vadd.f32 1e-05, %v458_v24  ;;  %v447_v26 = vpop.xlane.xlu0 %446 }
 0x42a   :  { %v461_v27 = vmul.f32 0.0625, %v447_v26 }
 0x42b   :  { %634 = vrsqrt.f32 %v466_v25  ;;  %v450_v30 = vpop.xlane.xlu1 %449 }
 0x42c   :  { %v469_v31 = vadd.f32 1e-05, %v461_v27  ;;  %v462_v32 = vmul.f32 0.0625, %v450_v30 }
 0x42d   :  { %v453_v33 = vpop.xlane.xlu0 %452 }
 0x42e   :  { %636 = vrsqrt.f32 %v469_v31  ;;  %v470_v34 = vadd.f32 1e-05, %v462_v32  ;;  %v463_v20 = vmul.f32 0.0625, %v453_v33 }
 0x42f   :  { %v629_v28 = vpop.eup %628  ;;  %v456_v36 = vpop.xlane.xlu1 %455 }
 0x430   :  { %v483_v37 = vmul.f32 %v629_v28, %v835_v38  ;;  %638 = vrsqrt.f32 %v470_v34  ;;  %v471_v21 = vadd.f32 1e-05, %v463_v20  ;;  %v464_v40 = vmul.f32 0.0625, %v456_v36 }
 0x431   :  { %v631_v29 = vpop.eup %630 }
 0x432   :  { %v498_v41 = vmul.f32 %v559_v35, %v483_v37  ;;  %v484_v43 = vmul.f32 %v631_v29, %v837_v42  ;;  %640 = vrsqrt.f32 %v471_v21  ;;  %v472_v44 = vadd.f32 1e-05, %v464_v40 }
 0x433   :  { %v633_v45 = vpop.eup %632 }
 0x434   :  { %v513_v47 = vadd.f32 %v560_v39, %v498_v41  ;;  %v499_v48 = vmul.f32 %v559_v35, %v484_v43  ;;  %v481_v49 = vmul.f32 %v633_v45, %v841_v46  ;;  %642 = vrsqrt.f32 %v472_v44 }
 0x435   :  { %v635_v38 = vpop.eup %634 }
 0x436   :  { %521 = vst.msk [vmem:[#allocation3 + $0x10] sm:$0xff] %vm383_vm2, %v513_v47  ;;  %v514_v51 = vadd.f32 %v560_v39, %v499_v48  ;;  %v496_v52 = vmul.f32 %v559_v35, %v481_v49  ;;  %v482_v53 = vmul.f32 %v635_v38, %v846_v50 }
 0x438   :  { %v637_v54 = vpop.eup %636  ;;  %522 = vst.msk [vmem:[#allocation3 + $0x18] sm:$0xff] %vm383_vm2, %v514_v51  ;;  %v511_v55 = vadd.f32 %v560_v39, %v496_v52  ;;  %v497_v42 = vmul.f32 %v559_v35, %v482_v53 }
 0x439   :  { %v485_v56 = vmul.f32 %v637_v54, %v854_v58 }
 0x43a   :  { %v639_v57 = vpop.eup %638  ;;  %519 = vst.msk [vmem:[#allocation3] sm:$0xff] %vm383_vm2, %v511_v55  ;;  %v512_v59 = vadd.f32 %v560_v39, %v497_v42 }
 0x43b   :  { %v500_v46 = vmul.f32 %v559_v35, %v485_v56  ;;  %v486_v60 = vmul.f32 %v639_v57, %v857_v62 }
 0x43c   :  { %v641_v61 = vpop.eup %640  ;;  %520 = vst.msk [vmem:[#allocation3 + $0x8] sm:$0xff] %vm383_vm2, %v512_v59 }
 0x43d   :  { %v515_v63 = vadd.f32 %v560_v39, %v500_v46  ;;  %v501_v0 = vmul.f32 %v559_v35, %v486_v60  ;;  %v487_v50 = vmul.f32 %v641_v61, %v861_v2 }
 0x43e   :  { %v643_v1 = vpop.eup %642 }
 0x43f   :  { %523 = vst.msk [vmem:[#allocation3 + $0x20] sm:$0xff] %vm383_vm2, %v515_v63  ;;  %v516_v3 = vadd.f32 %v560_v39, %v501_v0  ;;  %v502_v4 = vmul.f32 %v559_v35, %v487_v50  ;;  %v488_v58 = vmul.f32 %v643_v1, %v866_v6 }
 0x441   :  { %524 = vst.msk [vmem:[#allocation3 + $0x28] sm:$0xff] %vm383_vm2, %v516_v3  ;;  %v517_v5 = vadd.f32 %v560_v39, %v502_v4  ;;  %v503_v62 = vmul.f32 %v559_v35, %v488_v58 }
 0x443   :  { %525 = vst.msk [vmem:[#allocation3 + $0x30] sm:$0xff] %vm383_vm2, %v517_v5  ;;  %v518_v7 = vadd.f32 %v560_v39, %v503_v62 }
 0x445   :  { %526 = vst.msk [vmem:[#allocation3 + $0x38] sm:$0xff] %vm383_vm2, %v518_v7 }
 0x446   :  { %655 = shalt.err (!%p652_p4)
}
 0x447   :  { %s656_s12 = scalar_lea.hbm %s916_s7, 1024 }
 0x448   :  { %p657_p5 = scmp.ne.s32.totalorder %s916_s7, %s656_s12  ;;  %p660_p6 = scmp.lt.u32.totalorder %s656_s12, %s916_s7 }
 0x44a   :  { %p662_p7 = pnand %p660_p6, %p657_p5 }
 0x44c   :  { %665 = shalt.err (!%p662_p7)
}
 0x44d   :  { %s669_s0 = smov 128   ;;  %s670_s17 = smov 8  }
 0x44e   :  { %538 = dma.vmem_to_hbm [thread:$0]  %s533_s6, 1024, %s916_s7, [#allocation4], %s669_s0, %s669_s0, %s670_s17  }
 0x44f   :  { %666 = dma.done.wait [#allocation4], 1024  }
 0x450   :  { %667 = vsyncadd [#allocation4], 4294966272 }
 0x451   :  { %542 = vsyncpa [#allocation4], 1 }

</bundles_post_ra>
